<compile_context>
chip_gen: v7x
topology: tpu7x:2x2x1
jax: 0.10.0
libtpu: 0.0.40
codegen_flags: <defaults>
</compile_context>

<pallas_src>
import jax
import jax.numpy as jnp
from jax.experimental import pallas as pl
from jax.experimental.pallas import tpu as pltpu


def _round_up(x, m):
    return ((x + m - 1) // m) * m


# ---------------------------------------------------------------------------
# Fused kernel: masked CE (2 categorical heads) + masked BCE (binary heads),
# accumulated across batch-column tiles, finalized to a single scalar loss.
# ---------------------------------------------------------------------------
def dmt_loss_kernel(lab_ref, cat0_ref, cat1_ref, bin_ref, out_ref,
                    acc_loss_ref, acc_cnt_ref):
    # lab_ref     : [T,    tb]  float32 labels, -1.0 == ignore (batch on lanes)
    # cat0_ref    : [K,    tb]  raw logits, task 0
    # cat1_ref    : [K,    tb]  raw logits, task 1
    # bin_ref     : [T-2,  tb]  probabilities (post-sigmoid), tasks 2..T-1
    # out_ref     : [1, 1]      total loss (written on last tile only)
    # acc_loss_ref: [T,    tb]  per-task masked loss accumulator (over tiles)
    # acc_cnt_ref : [T,    tb]  per-task valid-count accumulator (over tiles)
    i = pl.program_id(0)
    T = lab_ref.shape[0]

    @pl.when(i == 0)
    def _init():
        acc_loss_ref[...] = jnp.zeros_like(acc_loss_ref)
        acc_cnt_ref[...] = jnp.zeros_like(acc_cnt_ref)

    labels = lab_ref[...]                                 # [T, tb]
    valid = (labels > -0.5).astype(jnp.float32)           # [T, tb]

    # ---- categorical heads: per-sample CE = lse(logits) - logits[target]
    def ce_head(logits, lab_row):
        # logits: [K, tb], lab_row: [1, tb] (float class index, -1 where ignored)
        m = jnp.max(logits, axis=0, keepdims=True)                               # [1, tb]
        lse = m + jnp.log(jnp.sum(jnp.exp(logits - m), axis=0, keepdims=True))   # [1, tb]
        cls = jnp.maximum(lab_row, 0.0).astype(jnp.int32)                        # [1, tb]
        kiota = jax.lax.broadcasted_iota(jnp.int32, logits.shape, 0)             # [K, tb]
        onehot = (kiota == cls).astype(jnp.float32)                              # [K, tb]
        picked = jnp.sum(logits * onehot, axis=0, keepdims=True)                 # [1, tb]
        return lse - picked                                                      # [1, tb]

    ce0 = ce_head(cat0_ref[...], labels[0:1, :])          # [1, tb]
    ce1 = ce_head(cat1_ref[...], labels[1:2, :])          # [1, tb]

    # ---- binary heads: BCE on probabilities, log clamped at -100 (torch BCELoss)
    p = bin_ref[...]                                      # [T-2, tb]
    y = labels[2:T, :]                                    # [T-2, tb]
    log_p = jnp.maximum(jnp.log(jnp.maximum(p, 0.0)), -100.0)
    log_1mp = jnp.maximum(jnp.log(jnp.maximum(1.0 - p, 0.0)), -100.0)
    bce = -(y * log_p + (1.0 - y) * log_1mp)              # [T-2, tb]

    # ---- per-task masked partial sums / counts for this tile (pure VPU adds)
    loss_mat = jnp.concatenate([ce0, ce1, bce], axis=0)   # [T, tb]
    acc_loss_ref[...] += loss_mat * valid
    acc_cnt_ref[...] += valid

    # ---- finalize once: lane-reduce, per-task mean, sum over tasks
    @pl.when(i == pl.num_programs(0) - 1)
    def _final():
        sums = jnp.sum(acc_loss_ref[...], axis=1, keepdims=True)   # [T, 1]
        cnts = jnp.sum(acc_cnt_ref[...], axis=1, keepdims=True)    # [T, 1]
        per_task = sums / cnts                                     # [T, 1]
        out_ref[...] = jnp.sum(per_task, axis=0, keepdims=True)    # [1, 1]


# ---------------------------------------------------------------------------
# Wrapper: packs the PyTorch-style (outputs list, labels) into lane-dense
# transposed arrays (batch on lanes), pads the batch with -1 ignore labels,
# and launches the fused kernel.
# ---------------------------------------------------------------------------
def dmt_loss_forward(outputs, labels, *, tile_cols=1024):
    """outputs: list; outputs[0], outputs[1]: [B, K] logits, outputs[j>=2]: [B, 1] probs.
    labels: [B, T] float32 with -1 marking ignored entries.  Returns scalar loss."""
    B, T = labels.shape
    assert len(outputs) == T and T >= 3
    labels = labels.astype(jnp.float32)
    cat0 = outputs[0].astype(jnp.float32)
    cat1 = outputs[1].astype(jnp.float32)
    K = cat0.shape[1]
    n_bin = T - 2
    # pack all binary heads into one [B, T-2] array, then transpose everything
    # so batch lands on the 128-lane (last) axis: pure layout plumbing.
    bin_probs = jnp.concatenate(
        [outputs[j].reshape(B, 1).astype(jnp.float32) for j in range(2, T)], axis=1
    )
    labels_t = labels.T        # [T, B]
    cat0_t = cat0.T            # [K, B]
    cat1_t = cat1.T            # [K, B]
    bin_t = bin_probs.T        # [T-2, B]

    # Column tiling: tile is a multiple of 128 (full lane utilization); pad the
    # batch with -1 (ignored) columns so the sentinel mask handles padding for free.
    tb = min(tile_cols, _round_up(B, 128))
    b_pad = _round_up(B, tb)
    pad = b_pad - B
    if pad:
        labels_t = jnp.pad(labels_t, ((0, 0), (0, pad)), constant_values=-1.0)
        cat0_t = jnp.pad(cat0_t, ((0, 0), (0, pad)))
        cat1_t = jnp.pad(cat1_t, ((0, 0), (0, pad)))
        bin_t = jnp.pad(bin_t, ((0, 0), (0, pad)), constant_values=0.5)

    out = pl.pallas_call(
        dmt_loss_kernel,
        out_shape=jax.ShapeDtypeStruct((1, 1), jnp.float32),
        grid_spec=pltpu.PrefetchScalarGridSpec(
            num_scalar_prefetch=0,
            grid=(b_pad // tb,),
            in_specs=[
                pl.BlockSpec((T, tb), lambda i: (0, i)),
                pl.BlockSpec((K, tb), lambda i: (0, i)),
                pl.BlockSpec((K, tb), lambda i: (0, i)),
                pl.BlockSpec((n_bin, tb), lambda i: (0, i)),
            ],
            out_specs=pl.BlockSpec((1, 1), lambda i: (0, 0)),
            scratch_shapes=[
                pltpu.VMEM((T, tb), jnp.float32),   # per-task masked loss sums
                pltpu.VMEM((T, tb), jnp.float32),   # per-task valid counts
            ],
        ),
        compiler_params=pltpu.CompilerParams(
            # single grid axis is a reduction into the VMEM accumulators
            dimension_semantics=("arbitrary",),
        ),
        cost_estimate=pl.CostEstimate(
            flops=b_pad * (10 * K + 14 * n_bin + 8 * T),
            transcendentals=b_pad * (2 * (K + 1) + 2 * n_bin),
            bytes_accessed=4 * b_pad * (T + 2 * K + n_bin) + 4,
        ),
    )(labels_t, cat0_t, cat1_t, bin_t)
    return out[0, 0]


# ---------------------------------------------------------------------------
# Pure-JAX reference (mirrors the PyTorch DMTLoss exactly).
# ---------------------------------------------------------------------------
def _reference_loss(outputs, labels):
    B, T = labels.shape
    total = jnp.float32(0.0)
    for j in range(T):
        lab = labels[:, j]
        mask = (lab != -1).astype(jnp.float32)
        cnt = jnp.sum(mask)
        if j < 2:
            logits = outputs[j]
            lse = jax.scipy.special.logsumexp(logits, axis=-1)
            cls = jnp.maximum(lab, 0).astype(jnp.int32)
            picked = jnp.take_along_axis(logits, cls[:, None], axis=1)[:, 0]
            per = lse - picked
        else:
            p = outputs[j][:, 0]
            log_p = jnp.maximum(jnp.log(p), -100.0)
            log_1mp = jnp.maximum(jnp.log(1.0 - p), -100.0)
            per = -(lab * log_p + (1.0 - lab) * log_1mp)
        total = total + jnp.sum(per * mask) / cnt
    return total


if __name__ == "__main__":
    key = jax.random.PRNGKey(0)
    K, T = 11, 5  # 2 categorical tasks (11 classes) + 3 binary attribute tasks

    def make_case(case_key, B):
        k1, k2, k3, k4, k5, k6 = jax.random.split(case_key, 6)
        cat0 = jax.random.normal(k1, (B, K), jnp.float32)
        cat1 = jax.random.normal(k2, (B, K), jnp.float32)
        bin_outs = [
            jax.nn.sigmoid(
                jax.random.normal(jax.random.fold_in(k3, j), (B, 1), jnp.float32)
            )
            for j in range(T - 2)
        ]
        outputs = [cat0, cat1] + bin_outs
        cat_lab = jax.random.randint(k4, (B, 2), 0, K).astype(jnp.float32)
        bin_lab = jax.random.randint(k5, (B, T - 2), 0, 2).astype(jnp.float32)
        labels = jnp.concatenate([cat_lab, bin_lab], axis=1)
        # randomly mark ~20% of entries ignored (-1); keep row 0 fully valid so
        # every task has at least one valid sample (as PyTorch implicitly assumes)
        ignore = jax.random.bernoulli(k6, 0.2, (B, T))
        ignore = ignore.at[0, :].set(False)
        labels = jnp.where(ignore, -1.0, labels)
        return outputs, labels

    # case 1: tiny batch -> single tile
    outputs, labels = make_case(jax.random.fold_in(key, 0), 8)
    loss = jax.block_until_ready(dmt_loss_forward(outputs, labels))
    ref = _reference_loss(outputs, labels)
    assert loss.shape == ()
    assert jnp.allclose(loss, ref, atol=1e-4, rtol=1e-4), (loss, ref)

    # case 2: multi-tile batch -> exercises the accumulate / finalize path
    outputs, labels = make_case(jax.random.fold_in(key, 1), 200)
    loss = jax.block_until_ready(dmt_loss_forward(outputs, labels, tile_cols=128))
    ref = _reference_loss(outputs, labels)
    assert jnp.allclose(loss, ref, atol=1e-4, rtol=1e-4), (loss, ref)

    print("KERNEL_OK")
</pallas_src>

<mosaic_0001>
module attributes {stable_mosaic.version = 11 : i64} {
  func.func @dmt_loss_kernel(%arg0: i32, %arg1: memref<5x128xf32, #tpu.memory_space<vmem>>, %arg2: memref<11x128xf32, #tpu.memory_space<vmem>>, %arg3: memref<11x128xf32, #tpu.memory_space<vmem>>, %arg4: memref<3x128xf32, #tpu.memory_space<vmem>>, %arg5: memref<1x1xf32, #tpu.memory_space<vmem>>, %arg6: memref<5x128xf32, #tpu.memory_space<vmem>>, %arg7: memref<5x128xf32, #tpu.memory_space<vmem>>) attributes {dimension_semantics = [#tpu.dimension_semantics<arbitrary>], iteration_bounds = array<i64: 1>, scalar_prefetch = 0 : i64, scratch_operands = 2 : i64, tpu.core_type = #tpu.core_type<tc>, window_params = [{transform_indices = @transform_0, window_bounds = array<i64: 5, 128>}, {transform_indices = @transform_1, window_bounds = array<i64: 11, 128>}, {transform_indices = @transform_2, window_bounds = array<i64: 11, 128>}, {transform_indices = @transform_3, window_bounds = array<i64: 3, 128>}, {pipeline_mode = #tpu.pipeline_mode<synchronous>, transform_indices = @transform_4, window_bounds = array<i64: 1, 1>}]} {
    %c0_i32 = arith.constant 0 : i32
    %0 = arith.cmpi eq, %arg0, %c0_i32 : i32
    %1 = arith.extui %0 : i1 to i32
    %c0_i32_0 = arith.constant 0 : i32
    %2 = arith.cmpi ne, %1, %c0_i32_0 : i32
    scf.if %2 {
      %cst_33 = arith.constant 0.000000e+00 : f32
      %86 = vector.broadcast %cst_33 : f32 to vector<5x128xf32>
      %c0_34 = arith.constant 0 : index
      %c0_35 = arith.constant 0 : index
      %87 = vector.load %arg6[%c0_34, %c0_35] : memref<5x128xf32, #tpu.memory_space<vmem>>, vector<5x128xf32>
      tpu.vector_store %arg6[%c0_34, %c0_35], %86 {strides = array<i32>} : memref<5x128xf32, #tpu.memory_space<vmem>>, vector<5x128xf32>,
      %cst_36 = arith.constant 0.000000e+00 : f32
      %88 = vector.broadcast %cst_36 : f32 to vector<5x128xf32>
      %c0_37 = arith.constant 0 : index
      %c0_38 = arith.constant 0 : index
      %89 = vector.load %arg7[%c0_37, %c0_38] : memref<5x128xf32, #tpu.memory_space<vmem>>, vector<5x128xf32>
      tpu.vector_store %arg7[%c0_37, %c0_38], %88 {strides = array<i32>} : memref<5x128xf32, #tpu.memory_space<vmem>>, vector<5x128xf32>,
    } else {
    }
    %c0 = arith.constant 0 : index
    %c0_1 = arith.constant 0 : index
    %3 = vector.load %arg1[%c0, %c0_1] : memref<5x128xf32, #tpu.memory_space<vmem>>, vector<5x128xf32>
    %cst = arith.constant -5.000000e-01 : f32
    %4 = vector.broadcast %cst : f32 to vector<5x128xf32>
    %5 = arith.cmpf ogt, %3, %4 : vector<5x128xf32>
    %6 = arith.extui %5 : vector<5x128xi1> to vector<5x128xi32>
    %7 = arith.sitofp %6 : vector<5x128xi32> to vector<5x128xf32>
    %c0_2 = arith.constant 0 : index
    %c0_3 = arith.constant 0 : index
    %8 = vector.load %arg2[%c0_2, %c0_3] : memref<11x128xf32, #tpu.memory_space<vmem>>, vector<11x128xf32>
    %9 = vector.extract_strided_slice %3 {offsets = [0, 0], sizes = [1, 128], strides = [1, 1]} : vector<5x128xf32> to vector<1x128xf32>
    %cst_4 = arith.constant dense<0xFF800000> : vector<128xf32>
    %10 = vector.multi_reduction <maximumf>, %8, %cst_4 [0] : vector<11x128xf32> to vector<128xf32>
    %11 = vector.shape_cast %10 : vector<128xf32> to vector<1x128xf32>
    %12 = vector.broadcast %11 : vector<1x128xf32> to vector<11x128xf32>
    %13 = arith.subf %8, %12 : vector<11x128xf32>
    %14 = math.exp %13 : vector<11x128xf32>
    %cst_5 = arith.constant dense<0.000000e+00> : vector<128xf32>
    %15 = vector.multi_reduction <add>, %14, %cst_5 [0] : vector<11x128xf32> to vector<128xf32>
    %16 = vector.shape_cast %15 : vector<128xf32> to vector<1x128xf32>
    %17 = math.log %16 : vector<1x128xf32>
    %18 = arith.addf %11, %17 : vector<1x128xf32>
    %cst_6 = arith.constant 0.000000e+00 : f32
    %19 = vector.broadcast %cst_6 : f32 to vector<1x128xf32>
    %20 = arith.maximumf %9, %19 : vector<1x128xf32>
    %21 = arith.fptosi %20 : vector<1x128xf32> to vector<1x128xi32>
    %22 = tpu.iota {dimensions = array<i32: 0>} : vector<11x128xi32>
    %23 = vector.broadcast %21 : vector<1x128xi32> to vector<11x128xi32>
    %24 = arith.cmpi eq, %22, %23 : vector<11x128xi32>
    %25 = arith.extui %24 : vector<11x128xi1> to vector<11x128xi32>
    %26 = arith.sitofp %25 : vector<11x128xi32> to vector<11x128xf32>
    %27 = arith.mulf %8, %26 : vector<11x128xf32>
    %cst_7 = arith.constant dense<0.000000e+00> : vector<128xf32>
    %28 = vector.multi_reduction <add>, %27, %cst_7 [0] : vector<11x128xf32> to vector<128xf32>
    %29 = vector.shape_cast %28 : vector<128xf32> to vector<1x128xf32>
    %30 = arith.subf %18, %29 : vector<1x128xf32>
    %c0_8 = arith.constant 0 : index
    %c0_9 = arith.constant 0 : index
    %31 = vector.load %arg3[%c0_8, %c0_9] : memref<11x128xf32, #tpu.memory_space<vmem>>, vector<11x128xf32>
    %32 = vector.extract_strided_slice %3 {offsets = [1, 0], sizes = [1, 128], strides = [1, 1]} : vector<5x128xf32> to vector<1x128xf32>
    %cst_10 = arith.constant dense<0xFF800000> : vector<128xf32>
    %33 = vector.multi_reduction <maximumf>, %31, %cst_10 [0] : vector<11x128xf32> to vector<128xf32>
    %34 = vector.shape_cast %33 : vector<128xf32> to vector<1x128xf32>
    %35 = vector.broadcast %34 : vector<1x128xf32> to vector<11x128xf32>
    %36 = arith.subf %31, %35 : vector<11x128xf32>
    %37 = math.exp %36 : vector<11x128xf32>
    %cst_11 = arith.constant dense<0.000000e+00> : vector<128xf32>
    %38 = vector.multi_reduction <add>, %37, %cst_11 [0] : vector<11x128xf32> to vector<128xf32>
    %39 = vector.shape_cast %38 : vector<128xf32> to vector<1x128xf32>
    %40 = math.log %39 : vector<1x128xf32>
    %41 = arith.addf %34, %40 : vector<1x128xf32>
    %cst_12 = arith.constant 0.000000e+00 : f32
    %42 = vector.broadcast %cst_12 : f32 to vector<1x128xf32>
    %43 = arith.maximumf %32, %42 : vector<1x128xf32>
    %44 = arith.fptosi %43 : vector<1x128xf32> to vector<1x128xi32>
    %45 = tpu.iota {dimensions = array<i32: 0>} : vector<11x128xi32>
    %46 = vector.broadcast %44 : vector<1x128xi32> to vector<11x128xi32>
    %47 = arith.cmpi eq, %45, %46 : vector<11x128xi32>
    %48 = arith.extui %47 : vector<11x128xi1> to vector<11x128xi32>
    %49 = arith.sitofp %48 : vector<11x128xi32> to vector<11x128xf32>
    %50 = arith.mulf %31, %49 : vector<11x128xf32>
    %cst_13 = arith.constant dense<0.000000e+00> : vector<128xf32>
    %51 = vector.multi_reduction <add>, %50, %cst_13 [0] : vector<11x128xf32> to vector<128xf32>
    %52 = vector.shape_cast %51 : vector<128xf32> to vector<1x128xf32>
    %53 = arith.subf %41, %52 : vector<1x128xf32>
    %c0_14 = arith.constant 0 : index
    %c0_15 = arith.constant 0 : index
    %54 = vector.load %arg4[%c0_14, %c0_15] : memref<3x128xf32, #tpu.memory_space<vmem>>, vector<3x128xf32>
    %55 = vector.extract_strided_slice %3 {offsets = [2, 0], sizes = [3, 128], strides = [1, 1]} : vector<5x128xf32> to vector<3x128xf32>
    %cst_16 = arith.constant 0.000000e+00 : f32
    %56 = vector.broadcast %cst_16 : f32 to vector<3x128xf32>
    %57 = arith.maximumf %54, %56 : vector<3x128xf32>
    %58 = math.log %57 : vector<3x128xf32>
    %cst_17 = arith.constant -1.000000e+02 : f32
    %59 = vector.broadcast %cst_17 : f32 to vector<3x128xf32>
    %60 = arith.maximumf %58, %59 : vector<3x128xf32>
    %cst_18 = arith.constant 1.000000e+00 : f32
    %61 = vector.broadcast %cst_18 : f32 to vector<3x128xf32>
    %62 = arith.subf %61, %54 : vector<3x128xf32>
    %cst_19 = arith.constant 0.000000e+00 : f32
    %63 = vector.broadcast %cst_19 : f32 to vector<3x128xf32>
    %64 = arith.maximumf %62, %63 : vector<3x128xf32>
    %65 = math.log %64 : vector<3x128xf32>
    %cst_20 = arith.constant -1.000000e+02 : f32
    %66 = vector.broadcast %cst_20 : f32 to vector<3x128xf32>
    %67 = arith.maximumf %65, %66 : vector<3x128xf32>
    %68 = arith.mulf %55, %60 : vector<3x128xf32>
    %cst_21 = arith.constant 1.000000e+00 : f32
    %69 = vector.broadcast %cst_21 : f32 to vector<3x128xf32>
    %70 = arith.subf %69, %55 : vector<3x128xf32>
    %71 = arith.mulf %70, %67 : vector<3x128xf32>
    %72 = arith.addf %68, %71 : vector<3x128xf32>
    %cst_22 = arith.constant 0.000000e+00 : f32
    %73 = vector.broadcast %cst_22 : f32 to vector<3x128xf32>
    %74 = arith.subf %73, %72 : vector<3x128xf32>
    %75 = tpu.concatenate %30, %53, %74 in 0 : vector<1x128xf32>, vector<1x128xf32>, vector<3x128xf32> -> vector<5x128xf32>
    %c0_23 = arith.constant 0 : index
    %c0_24 = arith.constant 0 : index
    %76 = vector.load %arg6[%c0_23, %c0_24] : memref<5x128xf32, #tpu.memory_space<vmem>>, vector<5x128xf32>
    %77 = arith.mulf %75, %7 : vector<5x128xf32>
    %78 = arith.addf %76, %77 : vector<5x128xf32>
    %c0_25 = arith.constant 0 : index
    %c0_26 = arith.constant 0 : index
    %79 = vector.load %arg6[%c0_25, %c0_26] : memref<5x128xf32, #tpu.memory_space<vmem>>, vector<5x128xf32>
    tpu.vector_store %arg6[%c0_25, %c0_26], %78 {strides = array<i32>} : memref<5x128xf32, #tpu.memory_space<vmem>>, vector<5x128xf32>,
    %c0_27 = arith.constant 0 : index
    %c0_28 = arith.constant 0 : index
    %80 = vector.load %arg7[%c0_27, %c0_28] : memref<5x128xf32, #tpu.memory_space<vmem>>, vector<5x128xf32>
    %81 = arith.addf %80, %7 : vector<5x128xf32>
    %c0_29 = arith.constant 0 : index
    %c0_30 = arith.constant 0 : index
    %82 = vector.load %arg7[%c0_29, %c0_30] : memref<5x128xf32, #tpu.memory_space<vmem>>, vector<5x128xf32>
    tpu.vector_store %arg7[%c0_29, %c0_30], %81 {strides = array<i32>} : memref<5x128xf32, #tpu.memory_space<vmem>>, vector<5x128xf32>,
    %c0_i32_31 = arith.constant 0 : i32
    %83 = arith.cmpi eq, %arg0, %c0_i32_31 : i32
    %84 = arith.extui %83 : i1 to i32
    %c0_i32_32 = arith.constant 0 : i32
    %85 = arith.cmpi ne, %84, %c0_i32_32 : i32
    scf.if %85 {
      %c0_33 = arith.constant 0 : index
      %c0_34 = arith.constant 0 : index
      %86 = vector.load %arg6[%c0_33, %c0_34] : memref<5x128xf32, #tpu.memory_space<vmem>>, vector<5x128xf32>
      %cst_35 = arith.constant dense<0.000000e+00> : vector<5xf32>
      %87 = vector.multi_reduction <add>, %86, %cst_35 [1] : vector<5x128xf32> to vector<5xf32>
      %88 = vector.shape_cast %87 : vector<5xf32> to vector<5x1xf32>
      %c0_36 = arith.constant 0 : index
      %c0_37 = arith.constant 0 : index
      %89 = vector.load %arg7[%c0_36, %c0_37] : memref<5x128xf32, #tpu.memory_space<vmem>>, vector<5x128xf32>
      %cst_38 = arith.constant dense<0.000000e+00> : vector<5xf32>
      %90 = vector.multi_reduction <add>, %89, %cst_38 [1] : vector<5x128xf32> to vector<5xf32>
      %91 = vector.shape_cast %90 : vector<5xf32> to vector<5x1xf32>
      %92 = arith.divf %88, %91 : vector<5x1xf32>
      %cst_39 = arith.constant dense<0.000000e+00> : vector<1xf32>
      %93 = vector.multi_reduction <add>, %92, %cst_39 [0] : vector<5x1xf32> to vector<1xf32>
      %94 = vector.shape_cast %93 : vector<1xf32> to vector<1x1xf32>
      %c0_40 = arith.constant 0 : index
      %c0_41 = arith.constant 0 : index
      %95 = vector.load %arg5[%c0_40, %c0_41] : memref<1x1xf32, #tpu.memory_space<vmem>>, vector<1x1xf32>
      tpu.vector_store %arg5[%c0_40, %c0_41], %94 {strides = array<i32>} : memref<1x1xf32, #tpu.memory_space<vmem>>, vector<1x1xf32>,
    } else {
    }
    return
  }
  func.func @transform_0(%arg0: i32) -> (i32, i32) {
    %c0_i32 = arith.constant 0 : i32
    %c0_i32_0 = arith.constant 0 : i32
    return %c0_i32, %arg0 : i32, i32
  }
  func.func @transform_1(%arg0: i32) -> (i32, i32) {
    %c0_i32 = arith.constant 0 : i32
    %c0_i32_0 = arith.constant 0 : i32
    return %c0_i32, %arg0 : i32, i32
  }
  func.func @transform_2(%arg0: i32) -> (i32, i32) {
    %c0_i32 = arith.constant 0 : i32
    %c0_i32_0 = arith.constant 0 : i32
    return %c0_i32, %arg0 : i32, i32
  }
  func.func @transform_3(%arg0: i32) -> (i32, i32) {
    %c0_i32 = arith.constant 0 : i32
    %c0_i32_0 = arith.constant 0 : i32
    return %c0_i32, %arg0 : i32, i32
  }
  func.func @transform_4(%arg0: i32) -> (i32, i32) {
    %c0_i32 = arith.constant 0 : i32
    %c0_i32_0 = arith.constant 0 : i32
    %c0_i32_1 = arith.constant 0 : i32
    return %c0_i32, %c0_i32_0 : i32, i32
  }
}

</mosaic_0001>

<bundles_post_ra>
// kernel: tpu_custom_call.1
= control target key start
LH: loop header
LB: loop body
LE: loop exit
PB: predicated region body
PF: predicated region fallthrough
CT: control target
= control target key end

     0   :  { %9 = vsyncpa [#allocation5], 0  ;;  %s501_s0 = inlined_call_operand.hbm [shape: f32[5,128], index: 0, kind: input, shape index: {}]   ;;  %s502_s1 = inlined_call_operand.hbm [shape: f32[11,128], index: 1, kind: input, shape index: {}]   ;;  %s503_s2 = inlined_call_operand.hbm [shape: f32[11,128], index: 2, kind: input, shape index: {}]   ;;  %s504_s3 = inlined_call_operand.vmem [shape: f32[3,128], index: 3, kind: input, shape index: {}]   ;;  %s505_s4 = inlined_call_operand.hbm [shape: f32[1,1], index: 4, kind: output, shape index: {}]  }
   0x1   :  { %10 = vsyncpa [#allocation8], 0 }
   0x2   :  { %11 = vsyncpa [#allocation6], 0  ;;  %s366_s15 = smov [#allocation7]   ;;  %s272_s19 = scalar_lea.hbm %s502_s1, 256 }
   0x3   :  { %s27_s16 = sshll.u32 %s366_s15, 4  ;;  %p273_p0 = scmp.ne.s32.totalorder %s502_s1, %s272_s19  ;;  %s28_s16 = int_to_ptr.vmem [resolvable:$true] %s27_s16 }
   0x4   :  { %p276_p1 = scmp.lt.u32.totalorder %s272_s19, %s502_s1 }
   0x6   :  { %p278_p2 = pnand %p276_p1, %p273_p0 }
   0x8   :  { %281 = shalt.err (!%p278_p2)
}
   0x9   :  { %s282_s24 = scalar_lea.vmem %s28_s16, 256  ;;  %p287_p4 = scmp.lt.s32.totalorder %s28_s16, %s28_s16 }
   0xa   :  { %p283_p3 = scmp.ne.s32.totalorder %s28_s16, %s282_s24  ;;  %p288_p5 = scmp.lt.s32.totalorder %s282_s24, %s282_s24 }
   0xc   :  { %p289_p6 = por %p288_p5, %p287_p4 }
   0xe   :  { %p290_p7 = pnand %p289_p6, %p283_p3 }
  0x10   :  { %293 = shalt.err (!%p290_p7)
}
  0x11   :  { %s367_s25 = smov 128   ;;  %s368_s26 = smov 8  }
  0x12   :  { %33 = dma.hbm_to_vmem [thread:$0]  %s502_s1, 256, %s28_s16, [#allocation8], %s367_s25, %s367_s25, %s368_s26  }
  0x13   :  { %s369_s29 = smov [#allocation4]   ;;  %s370_s5 = smov [#allocation9]  }
  0x14   :  { %s18_s30 = sshll.u32 %s369_s29, 4  ;;  %s39_s6 = sshll.u32 %s370_s5, 4  ;;  %s19_s30 = int_to_ptr.vmem [resolvable:$true] %s18_s30  ;;  %s40_s6 = int_to_ptr.vmem [resolvable:$true] %s39_s6 }
  0x15   :  { %s294_s9 = scalar_lea.hbm %s501_s0, 128 }
  0x16   :  { %p295_p8 = scmp.ne.s32.totalorder %s501_s0, %s294_s9  ;;  %p298_p9 = scmp.lt.u32.totalorder %s294_s9, %s501_s0 }
  0x18   :  { %p300_p10 = pnand %p298_p9, %p295_p8 }
  0x1a   :  { %303 = shalt.err (!%p300_p10)
}
  0x1b   :  { %s304_s1 = scalar_lea.vmem %s19_s30, 128  ;;  %p309_p12 = scmp.lt.s32.totalorder %s19_s30, %s19_s30 }
  0x1c   :  { %p305_p11 = scmp.ne.s32.totalorder %s19_s30, %s304_s1  ;;  %p310_p13 = scmp.lt.s32.totalorder %s304_s1, %s304_s1 }
  0x1e   :  { %p311_p0 = por %p310_p13, %p309_p12 }
  0x20   :  { %p312_p1 = pnand %p311_p0, %p305_p11 }
  0x22   :  { %315 = shalt.err (!%p312_p1)
}
  0x23   :  { %21 = dma.hbm_to_vmem [thread:$0]  %s501_s0, 128, %s19_s30, [#allocation5]  }
  0x24   :  { %s316_s18 = scalar_lea.hbm %s503_s2, 256 }
  0x25   :  { %p317_p2 = scmp.ne.s32.totalorder %s503_s2, %s316_s18  ;;  %p320_p3 = scmp.lt.u32.totalorder %s316_s18, %s503_s2 }
  0x27   :  { %p322_p4 = pnand %p320_p3, %p317_p2 }
  0x29   :  { %325 = shalt.err (!%p322_p4)
}
  0x2a   :  { %s326_s23 = scalar_lea.vmem %s40_s6, 256  ;;  %p331_p6 = scmp.lt.s32.totalorder %s40_s6, %s40_s6 }
  0x2b   :  { %p327_p5 = scmp.ne.s32.totalorder %s40_s6, %s326_s23  ;;  %p332_p7 = scmp.lt.s32.totalorder %s326_s23, %s326_s23 }
  0x2d   :  { %p333_p8 = por %p332_p7, %p331_p6 }
  0x2f   :  { %p334_p9 = pnand %p333_p8, %p327_p5 }
  0x31   :  { %337 = shalt.err (!%p334_p9)
}
  0x32   :  { %45 = dma.hbm_to_vmem [thread:$0]  %s503_s2, 256, %s40_s6, [#allocation8], %s367_s25, %s367_s25, %s368_s26  }
  0x33   :  { %360 = dma.done.wait [#allocation5], 128  }
  0x34   :  { %361 = vsyncadd [#allocation5], 4294967168 }
  0x35   :  { %362 = dma.done.wait [#allocation8], 512  }
  0x36   :  { %363 = vsyncadd [#allocation8], 4294966784  ;;  %v371_v0 = vmov 0.0   ;;  %vm69_vm0 = vcmask 1042432   ;;  %v442_v1 = vld [vmem:[#allocation4] sm:$0x1f]  ;;  %v97_v15 = vlaneseq }
  0x37   :  { %62 = vst [vmem:[#allocation3] sm:$0x1f] %v371_v0  ;;  %61 = vst [vmem:[#allocation2] sm:$0x1f] %v371_v0  ;;  %v444_v2 = vld [vmem:[#allocation7] sm:$0xff]  ;;  %vm64_vm1 = vcmp.gt.f32.partialorder %v442_v1, -0.5 }
  0x38   :  { %v68_v3 = vld [vmem:[#allocation7 + $0x8] sm:$0x7]  ;;  %v448_v5 = vld [vmem:[#allocation9] sm:$0xff]  ;;  %v122_v6 = vld [vmem:[#allocation9 + $0x8] sm:$0x7]  ;;  %v451_v7 = vsel %vm64_vm1, 1.0, %v371_v0 }
  0x39   :  { %v70_v4 = vsel %vm69_vm0, %v68_v3, -inf  ;;  %v123_v9 = vsel %vm69_vm0, %v122_v6, -inf  ;;  %v95_v14 = vmax.f32 %v442_v1, 0.0  ;;  %v98_v21 = vshrl.u32 %v97_v15, 7  ;;  %v169_v45 = vld [vmem:[%s504_s3] sm:$0x7] }
  0x3a   :  { %v71_v8 = vmax.f32 %v444_v2, %v70_v4  ;;  %v124_v10 = vmax.f32 %v448_v5, %v123_v9  ;;  %vm205_vm2 = vcmask 1044480   ;;  %v174_v46 = vsub.f32 1.0, %v169_v45  ;;  %s372_s3 = smov [#allocation10]  }
  0x3b   :  { %v245_v20 = vtrunc.f32 %v95_v14  ;;  %v102_v27 = vsub.s32 0, %v98_v21  ;;  %v150_v33 = vsub.s32 1, %v98_v21  ;;  %v99_v36 = vadd.s32 8, %v98_v21  ;;  %s230_s26 = sshll.u32 %s372_s3, 4  ;;  %s231_s26 = int_to_ptr.vmem [resolvable:$true] %s230_s26 }
  0x3c   :  { %v72_v12 = vrot.slane %v71_v8, 4  ;;  %v125_v16 = vrot.slane %v124_v10, 4  ;;  %v170_v48 = vmax.f32 %v169_v45, 0.0  ;;  %v175_v50 = vmax.f32 %v174_v46, 0.0  ;;  %s338_s27 = scalar_lea.vmem %s231_s26, 16  ;;  %s342_s28 = scalar_lea.vmem %s231_s26, 32 }
  0x3d   :  { %v246_v26 = vcvt.f32.s32 %v245_v20  ;;  %vm190_vm7 = vcmask 1040384   ;;  %vm192_vm8 = vcmask 1041408   ;;  %vm222_vm9 = vcmask 0   ;;  %p339_p10 = scmp.ne.s32.totalorder %s231_s26, %s338_s27  ;;  %p343_p11 = scmp.lt.s32.totalorder %s231_s26, %s231_s26 }
  0x3e   :  { %v198_v11 = vld [vmem:[#allocation3] sm:$0x1f]  ;;  %v73_v17 = vmax.f32 %v71_v8, %v72_v12  ;;  %v126_v18 = vmax.f32 %v124_v10, %v125_v16  ;;  %p344_p12 = scmp.lt.s32.totalorder %s342_s28, %s338_s27 }
  0x3f   :  { %v199_v13 = vadd.f32 %v451_v7, %v198_v11  ;;  %v103_v37 = vrot.slane %v246_v26, %v102_v27  ;;  %v151_v44 = vrot.slane %v246_v26, %v150_v33 }
  0x40   :  { %v74_v19 = vrot.slane %v73_v17, 2  ;;  %v127_v22 = vrot.slane %v126_v18, 2  ;;  %p345_p13 = por %p344_p12, %p343_p11 }
  0x41   :  { %200 = vst [vmem:[#allocation3] sm:$0x1f] %v199_v13  ;;  %vm105_vm3 = vcmp.eq.s32.totalorder %v99_v36, %v103_v37  ;;  %vm153_vm4 = vcmp.eq.s32.totalorder %v99_v36, %v151_v44  ;;  %vm104_vm5 = vcmp.eq.s32.totalorder %v98_v21, %v103_v37  ;;  %vm152_vm6 = vcmp.eq.s32.totalorder %v98_v21, %v151_v44 }
  0x42   :  { %v75_v23 = vmax.f32 %v73_v17, %v74_v19  ;;  %v128_v24 = vmax.f32 %v126_v18, %v127_v22  ;;  %v242_v47 = vsel %vm105_vm3, 1.0, %v371_v0  ;;  %v244_v49 = vsel %vm153_vm4, 1.0, %v371_v0  ;;  %p346_p0 = pnand %p345_p13, %p339_p10 }
  0x43   :  { %v241_v51 = vsel %vm104_vm5, 1.0, %v371_v0  ;;  %v111_v52 = vmul.f32 %v242_v47, %v68_v3  ;;  %v243_v53 = vsel %vm152_vm6, 1.0, %v371_v0  ;;  %v159_v54 = vmul.f32 %v244_v49, %v122_v6 }
  0x44   :  { %v76_v25 = vrot.slane %v75_v23, 1  ;;  %v129_v28 = vrot.slane %v128_v24, 1  ;;  %v110_v56 = vmul.f32 %v241_v51, %v444_v2  ;;  %v158_v61 = vmul.f32 %v243_v53, %v448_v5 }
  0x45   :  { %v112_v58 = vsel %vm69_vm0, %v111_v52, 0.0 }
  0x46   :  { %v458_v30 = vmax.f32 %v75_v23, %v76_v25  ;;  %v461_v32 = vmax.f32 %v128_v24, %v129_v28  ;;  %v113_v4 = vadd.f32 %v112_v58, %v110_v56 }
  0x48   :  { %v209_v29 = vld [vmem:[#allocation3] sm:$0x1f]  ;;  %v78_v34 = vsub.f32 %v444_v2, %v458_v30  ;;  %v79_v35 = vsub.f32 %v68_v3, %v458_v30  ;;  %v131_v38 = vsub.f32 %v448_v5, %v461_v32  ;;  %v132_v39 = vsub.f32 %v122_v6, %v461_v32 }
  0x49   :  { %v210_v31 = vsel %vm205_vm2, %v209_v29, 0.0  ;;  %v160_v3 = vsel %vm69_vm0, %v159_v54, 0.0  ;;  %v114_v11 = vrot.slane %v113_v4, 4 }
  0x4a   :  { %211 = vadd.xlane.f32.xlu0 %v210_v31  ;;  %v80_v40 = vmul.f32 1.442695, %v78_v34  ;;  %v82_v41 = vmul.f32 1.442695, %v79_v35  ;;  %v133_v42 = vmul.f32 1.442695, %v131_v38  ;;  %v161_v9 = vadd.f32 %v160_v3, %v158_v61 }
  0x4b   :  { %v135_v43 = vmul.f32 1.442695, %v132_v39  ;;  %v115_v18 = vadd.f32 %v114_v11, %v113_v4  ;;  %v183_v35 = vsub.f32 1.0, %v442_v1 }
  0x4c   :  { %254 = vpow2.f32 %v80_v40  ;;  %v162_v16 = vrot.slane %v161_v9, 4 }
  0x4d   :  { %256 = vpow2.f32 %v82_v41  ;;  %v116_v26 = vrot.slane %v115_v18, 2 }
  0x4e   :  { %258 = vpow2.f32 %v133_v42  ;;  %v163_v23 = vadd.f32 %v162_v16, %v161_v9 }
  0x4f   :  { %260 = vpow2.f32 %v135_v43  ;;  %v117_v33 = vadd.f32 %v116_v26, %v115_v18 }
  0x50   :  { %262 = vlog2.f32 %v170_v48  ;;  %v164_v31 = vrot.slane %v163_v23, 2 }
  0x51   :  { %264 = vlog2.f32 %v175_v50  ;;  %v118_v38 = vrot.slane %v117_v33, 1 }
  0x52   :  { %v165_v37 = vadd.f32 %v164_v31, %v163_v23 }
  0x53   :  { %v119_v44 = vadd.f32 %v118_v38, %v117_v33 }
  0x54   :  { %v166_v41 = vrot.slane %v165_v37, 1 }
  0x56   :  { %v255_v55 = vpop.eup %254  ;;  %v167_v49 = vadd.f32 %v166_v41, %v165_v37 }
  0x57   :  { %v257_v57 = vpop.eup %256 }
  0x58   :  { %v259_v59 = vpop.eup %258  ;;  %v84_v60 = vsel %vm69_vm0, %v257_v57, 0.0 }
  0x59   :  { %v261_v62 = vpop.eup %260  ;;  %v85_v63 = vadd.f32 %v255_v55, %v84_v60  ;;  %v194_v55 = vld [vmem:[#allocation2] sm:$0x1f] }
  0x5a   :  { %v137_v0 = vsel %vm69_vm0, %v261_v62, 0.0  ;;  %v263_v12 = vpop.eup %262 }
  0x5b   :  { %v86_v6 = vrot.slane %v85_v63, 4  ;;  %v138_v8 = vadd.f32 %v259_v59, %v137_v0  ;;  %v265_v15 = vpop.eup %264  ;;  %v172_v21 = vmul.f32 0.6931472, %v263_v12 }
  0x5c   :  { %v177_v22 = vmul.f32 0.6931472, %v265_v15 }
  0x5d   :  { %v87_v2 = vadd.f32 %v86_v6, %v85_v63  ;;  %v139_v10 = vrot.slane %v138_v8, 4  ;;  %v173_v28 = vmax.f32 %v172_v21, -100.0 }
  0x5e   :  { %v178_v29 = vmax.f32 %v177_v22, -100.0 }
  0x5f   :  { %v88_v13 = vrot.slane %v87_v2, 2  ;;  %v140_v14 = vadd.f32 %v139_v10, %v138_v8  ;;  %v180_v34 = vrot.slane %v173_v28, 6 }
  0x60   :  { %v185_v36 = vrot.slane %v178_v29, 6 }
  0x61   :  { %v89_v17 = vadd.f32 %v88_v13, %v87_v2  ;;  %v141_v5 = vrot.slane %v140_v14, 2  ;;  %v182_v39 = vmul.f32 %v180_v34, %v442_v1 }
  0x62   :  { %v187_v40 = vmul.f32 %v185_v36, %v183_v35 }
  0x63   :  { %v90_v19 = vrot.slane %v89_v17, 1  ;;  %v142_v20 = vadd.f32 %v141_v5, %v140_v14 }
  0x64   :  { %v188_v46 = vadd.f32 %v187_v40, %v182_v39 }
  0x65   :  { %v91_v24 = vadd.f32 %v90_v19, %v89_v17  ;;  %v143_v25 = vrot.slane %v142_v20, 1 }
  0x66   :  { %v189_v52 = vsub.f32 0.0, %v188_v46 }
  0x67   :  { %266 = vlog2.f32 %v91_v24  ;;  %v144_v27 = vadd.f32 %v143_v25, %v142_v20 }
  0x69   :  { %268 = vlog2.f32 %v144_v27 }
  0x71   :  { %v267_v42 = vpop.eup %266 }
  0x72   :  { %v93_v43 = vmul.f32 0.6931472, %v267_v42 }
  0x73   :  { %v269_v45 = vpop.eup %268 }
  0x74   :  { %v94_v47 = vadd.f32 %v93_v43, %v458_v30  ;;  %v146_v48 = vmul.f32 0.6931472, %v269_v45 }
  0x76   :  { %v120_v50 = vsub.f32 %v94_v47, %v119_v44  ;;  %v147_v51 = vadd.f32 %v146_v48, %v461_v32 }
  0x78   :  { %v168_v53 = vsub.f32 %v147_v51, %v167_v49 }
  0x7a   :  { %v191_v54 = vsel %vm190_vm7, %v120_v50, %v168_v53 }
  0x7b   :  { %v193_v1 = vsel %vm192_vm8, %v191_v54, %v189_v52 }
  0x7c   :  { %v195_v56 = vmul.f32 %v451_v7, %v193_v1 }
  0x7e   :  { %v196_v57 = vadd.f32 %v195_v56, %v194_v55 }
  0x80   :  { %197 = vst [vmem:[#allocation2] sm:$0x1f] %v196_v57 }
  0x87   :  { %v204_v58 = vld [vmem:[#allocation2] sm:$0x1f] }
  0x88   :  { %v206_v59 = vsel %vm205_vm2, %v204_v58, 0.0 }
  0x89   :  { %207 = vadd.xlane.f32.xlu0 %v206_v59 }
  0xd7   :  { %v212_v30 = vpop.xlane.xlu0 %211 }
  0xd8   :  { %270 = vrcp.f32 %v212_v30 }
  0xe2   :  { %v271_v60 = vpop.eup %270 }
 0x116   :  { %v208_v61 = vpop.xlane.xlu0 %207 }
 0x117   :  { %v214_v32 = vmul.f32 %v271_v60, %v208_v61 }
 0x119   :  { %v215_v62 = vsel %vm205_vm2, %v214_v32, 0.0 }
 0x11a   :  { %v216_v63 = vrot.slane %v215_v62, 4 }
 0x11c   :  { %v217_v3 = vadd.f32 %v216_v63, %v215_v62 }
 0x11e   :  { %v218_v4 = vrot.slane %v217_v3, 2 }
 0x120   :  { %v219_v0 = vadd.f32 %v218_v4, %v217_v3 }
 0x122   :  { %v220_v7 = vrot.slane %v219_v0, 1 }
 0x124   :  { %v221_v6 = vadd.f32 %v220_v7, %v219_v0 }
 0x126   :  { %223 = vst.msk [vmem:[#allocation10] sm:$0x1] %vm222_vm9, %v221_v6 }
 0x127   :  { %349 = shalt.err (!%p346_p0)
}
 0x128   :  { %s350_s5 = scalar_lea.hbm %s505_s4, 16 }
 0x129   :  { %p351_p1 = scmp.ne.s32.totalorder %s505_s4, %s350_s5  ;;  %p354_p2 = scmp.lt.u32.totalorder %s350_s5, %s505_s4 }
 0x12b   :  { %p356_p3 = pnand %p354_p2, %p351_p1 }
 0x12d   :  { %359 = shalt.err (!%p356_p3)
}
 0x12e   :  { %233 = dma.vmem_to_hbm [thread:$0]  %s231_s26, 16, %s505_s4, [#allocation6]  }
 0x12f   :  { %364 = dma.done.wait [#allocation6], 16  }
 0x130   :  { %365 = vsyncadd [#allocation6], 4294967280 }
 0x131   :  { %237 = vsyncpa [#allocation5], 1 }
 0x132   :  { %238 = vsyncpa [#allocation8], 1 }
 0x133   :  { %239 = vsyncpa [#allocation6], 1 }

</bundles_post_ra>
